<compile_context>
chip_gen: v7x
topology: tpu7x:2x2x1
jax: 0.10.0
libtpu: 0.0.40
codegen_flags: <defaults>
</compile_context>

<pallas_src>
import math
import numpy as np
import jax
import jax.numpy as jnp
from jax.experimental import pallas as pl
from jax.experimental.pallas import tpu as pltpu


# ----------------------------------------------------------------------------
# DCT-filter construction (parameter setup, plain Python/NumPy glue)
# ----------------------------------------------------------------------------
def get_freq_indices(method):
    assert method in ['top1', 'top2', 'top4', 'top8', 'top16', 'top32',
                      'bot1', 'bot2', 'bot4', 'bot8', 'bot16', 'bot32',
                      'low1', 'low2', 'low4', 'low8', 'low16', 'low32']
    num_freq = int(method[3:])
    if 'top' in method:
        all_x = [0, 0, 6, 0, 0, 1, 1, 4, 5, 1, 3, 0, 0, 0, 3, 2,
                 4, 6, 3, 5, 5, 2, 6, 5, 5, 3, 3, 4, 2, 2, 6, 1]
        all_y = [0, 1, 0, 5, 2, 0, 2, 0, 0, 6, 0, 4, 6, 3, 5, 2,
                 6, 3, 3, 3, 5, 1, 1, 2, 4, 2, 1, 1, 3, 0, 5, 3]
    elif 'low' in method:
        all_x = [0, 0, 1, 1, 0, 2, 2, 1, 2, 0, 3, 4, 0, 1, 3, 0,
                 1, 2, 3, 4, 5, 0, 1, 2, 3, 4, 5, 6, 1, 2, 3, 4]
        all_y = [0, 1, 0, 1, 2, 0, 1, 2, 2, 3, 0, 0, 4, 3, 1, 5,
                 4, 3, 2, 1, 0, 6, 5, 4, 3, 2, 1, 0, 6, 5, 4, 3]
    else:  # bot
        all_x = [6, 1, 3, 3, 2, 4, 1, 2, 4, 4, 5, 1, 4, 6, 2, 5,
                 6, 1, 6, 2, 2, 4, 3, 3, 5, 5, 6, 2, 5, 5, 3, 6]
        all_y = [6, 4, 4, 6, 6, 3, 1, 4, 4, 5, 6, 5, 2, 2, 5, 1,
                 4, 3, 5, 0, 3, 1, 1, 2, 4, 2, 1, 1, 5, 3, 3, 3]
    return all_x[:num_freq], all_y[:num_freq]


def make_freq_filters(height, width, mapper_x, mapper_y):
    """The F distinct spatial DCT filters, shape (F, height, width)."""
    def build_filter(pos, freq, POS):
        r = math.cos(math.pi * freq * (pos + 0.5) / POS) / math.sqrt(POS)
        return r if freq == 0 else r * math.sqrt(2)

    nf = len(mapper_x)
    f = np.zeros((nf, height, width), dtype=np.float32)
    for i, (u_x, v_y) in enumerate(zip(mapper_x, mapper_y)):
        for tx in range(height):
            for ty in range(width):
                f[i, tx, ty] = (build_filter(tx, u_x, height)
                                * build_filter(ty, v_y, width))
    return jnp.asarray(f)


# ----------------------------------------------------------------------------
# Pallas kernel
# ----------------------------------------------------------------------------
def _msa_kernel(x_ref, wft_ref, sel_ref, w1t_ref, w2t_ref, out_ref):
    # x_ref  : (Bn, C, HW)  input block, original dtype
    # wft    : (F,  HW)     distinct DCT filters (adaptive pool folded in), f32
    # sel    : (C,  F)      one-hot per-channel frequency selector, f32
    # w1t    : (C,  Cr)     fc1 weight transposed
    # w2t    : (Cr, C)      fc2 weight transposed
    # out_ref: (Bn, C, HW)
    bn, c, hw = x_ref.shape
    nf = wft_ref.shape[0]

    x = x_ref[...]                                           # (Bn, C, HW)

    # Rank-structured fused adaptive-pool + DCT: one MXU matmul against the
    # (F, HW) filter bank, then a tiny one-hot per-channel frequency pick.
    xm = x.reshape(bn * c, hw).astype(jnp.float32)
    z = jax.lax.dot_general(                                 # (Bn*C, F)
        xm, wft_ref[...],
        dimension_numbers=(((1,), (1,)), ((), ())),
        preferred_element_type=jnp.float32)
    y = jnp.sum(z.reshape(bn, c, nf) * sel_ref[...][None], axis=-1)   # (Bn, C)

    # Squeeze-excite FC: Linear -> ReLU -> Linear -> Sigmoid, batched over Bn.
    h = jnp.maximum(
        jnp.dot(y, w1t_ref[...], preferred_element_type=jnp.float32), 0.0)
    s = jax.nn.sigmoid(
        jnp.dot(h, w2t_ref[...], preferred_element_type=jnp.float32))   # (Bn, C)

    # Channel re-scaling in the input dtype: no f32 copy of x stays live.
    out_ref[...] = (x * s.astype(x.dtype)[:, :, None]).astype(out_ref.dtype)


# ----------------------------------------------------------------------------
# VMEM-honest block sizing
# ----------------------------------------------------------------------------
def _round_up(v, m):
    return (v + m - 1) // m * m


def _vmem_capacity_bytes():
    try:
        return int(pltpu.get_tpu_info().vmem_capacity_bytes)
    except Exception:
        return 64 << 20          # conservative: v7x per-TensorCore VMEM


def _padded_slab_bytes(rows, cols, dtype):
    """Bytes of a (rows, cols) slab in VMEM with (8,128) tiling and dtype
    sublane packing (f32 -> 8 sublanes, bf16 -> 16, int8 -> 32)."""
    itemsize = jnp.dtype(dtype).itemsize
    sub = 8 * max(1, 4 // itemsize)
    return _round_up(rows, sub) * _round_up(cols, 128) * itemsize


def _pick_batch_block(n, c, hw, dtype, vmem_limit, const_bytes):
    per_sample = _padded_slab_bytes(c, hw, dtype)            # one padded (C,HW) slab
    # Temporaries that scale with Bn: z / s (f32, lane-padded) + staged output.
    temps = 2 * _padded_slab_bytes(c, 128, jnp.float32) + per_sample
    per_bn = 4 * per_sample + temps                          # 2 in + 2 out buffers
    budget = int(vmem_limit * 0.75) - const_bytes
    bn = max(1, min(n, budget // max(1, per_bn)))
    # Keep >=2 grid steps (v7x megacore + DMA/compute overlap); prefer >=4
    # steps when the per-step block stays comfortably large (>=2 MiB).
    if n >= 4 and (n // 4) * per_sample >= (2 << 20):
        bn = min(bn, n // 4)
    elif n >= 2:
        bn = min(bn, n // 2)
    while n % bn:                                            # keep blocks even
        bn -= 1
    return bn


# ----------------------------------------------------------------------------
# Wrapper
# ----------------------------------------------------------------------------
def multi_spectral_attention(x, freq_filters, w1, w2, dct_h, dct_w):
    n, c, h, w = x.shape
    nf = freq_filters.shape[0]
    assert c % nf == 0
    cr = w1.shape[0]
    hw = h * w

    # Fold adaptive_avg_pool2d (block mean) into the per-frequency DCT weights
    # so the kernel reads x exactly once:
    #   sum_{dhw} mean_block(x) * w  ==  sum_{hw} x * repeat(w) / (bh*bw)
    if (h, w) != (dct_h, dct_w):
        # TODO(synk): general adaptive_avg_pool2d for non-divisible spatial sizes
        assert h % dct_h == 0 and w % dct_w == 0, \
            "only divisible adaptive pooling is supported"
        bh, bw = h // dct_h, w // dct_w
        wf = (jnp.repeat(jnp.repeat(freq_filters, bh, axis=1), bw, axis=2)
              / float(bh * bw))
    else:
        wf = freq_filters
    wft = wf.reshape(nf, hw).astype(jnp.float32)             # (F, HW), HW lane-dense

    # One-hot per-channel frequency selector (channel group g uses filter g).
    sel = jnp.eye(nf, dtype=jnp.float32)[jnp.arange(c) // (c // nf)]   # (C, F)

    w1t = jnp.asarray(w1, jnp.float32).T                     # (C, Cr)
    w2t = jnp.asarray(w2, jnp.float32).T                     # (Cr, C)

    x_flat = x.reshape(n, c, hw)

    vmem_limit = min(int(_vmem_capacity_bytes() * 0.85), 100 << 20)
    const_bytes = 2 * (_padded_slab_bytes(nf, hw, jnp.float32)
                       + _padded_slab_bytes(c, nf, jnp.float32)
                       + _padded_slab_bytes(c, cr, jnp.float32)
                       + _padded_slab_bytes(cr, c, jnp.float32))
    bn = _pick_batch_block(n, c, hw, x.dtype, vmem_limit, const_bytes)
    grid = (n // bn,)

    itemsize = jnp.dtype(x.dtype).itemsize
    cost = pl.CostEstimate(
        flops=int(2 * n * c * hw * nf + 2 * n * c * nf
                  + 4 * n * c * cr + n * c * hw),
        transcendentals=int(n * c),
        bytes_accessed=int(2 * n * c * hw * itemsize
                           + 4 * (nf * hw + c * nf + 2 * c * cr)),
    )

    def build(single_buffered_consts):
        if single_buffered_consts:
            def cspec(shape):
                return pl.BlockSpec(shape, lambda i: (0, 0),
                                    pipeline_mode=pl.Buffered(1))
        else:
            def cspec(shape):
                return pl.BlockSpec(shape, lambda i: (0, 0))
        return pl.pallas_call(
            _msa_kernel,
            out_shape=jax.ShapeDtypeStruct((n, c, hw), x.dtype),
            grid=grid,
            in_specs=[
                pl.BlockSpec((bn, c, hw), lambda i: (i, 0, 0)),
                cspec((nf, hw)),       # VMEM-resident constants
                cspec((c, nf)),
                cspec((c, cr)),
                cspec((cr, c)),
            ],
            out_specs=pl.BlockSpec((bn, c, hw), lambda i: (i, 0, 0)),
            compiler_params=pltpu.CompilerParams(
                dimension_semantics=("parallel",),
                vmem_limit_bytes=vmem_limit),
            cost_estimate=cost,
        )

    try:
        out = jax.block_until_ready(build(True)(x_flat, wft, sel, w1t, w2t))
    except Exception:
        # Fallback for JAX versions without BlockSpec(pipeline_mode=Buffered(1));
        # constants are small, so default double-buffering is still fine.
        out = jax.block_until_ready(build(False)(x_flat, wft, sel, w1t, w2t))

    return out.reshape(n, c, h, w)


# ----------------------------------------------------------------------------
# Pure-JAX reference (mirrors the PyTorch forward)
# ----------------------------------------------------------------------------
def reference(x, dct_filter, w1, w2, dct_h, dct_w):
    n, c, h, w = x.shape
    xp = x if (h, w) == (dct_h, dct_w) else \
        x.reshape(n, c, dct_h, h // dct_h, dct_w, w // dct_w).mean(axis=(3, 5))
    y = jnp.sum(xp * dct_filter[None], axis=(2, 3))           # (N, C)
    hdd = jnp.maximum(y @ w1.T, 0.0)                          # (N, Cr)
    s = jax.nn.sigmoid(hdd @ w2.T)                            # (N, C)
    return x * s[:, :, None, None]


if __name__ == "__main__":
    # Small, module-consistent shapes: channel divisible by num_split(16),
    # dct_h = dct_w = 7 (canonical FcaNet DCT tile), reduction = 16.
    n, channel = 2, 32
    dct_h = dct_w = 7
    reduction = 16
    freq_sel_method = 'top16'

    mapper_x, mapper_y = get_freq_indices(freq_sel_method)
    mapper_x = [t * (dct_h // 7) for t in mapper_x]
    mapper_y = [t * (dct_w // 7) for t in mapper_y]
    freq_filters = make_freq_filters(dct_h, dct_w, mapper_x, mapper_y)  # (F,7,7)
    c_part = channel // freq_filters.shape[0]
    # Per-channel filter (matches the PyTorch registered buffer layout).
    dct_filter = jnp.repeat(freq_filters, c_part, axis=0)               # (C,7,7)

    key = jax.random.PRNGKey(0)
    kx1, kx2, k1, k2 = jax.random.split(key, 4)

    cr = channel // reduction
    # Deterministic synthetic Linear weights (no bias), PyTorch (out, in) layout.
    w1 = (jax.random.uniform(k1, (cr, channel), dtype=jnp.float32,
                             minval=-1.0, maxval=1.0) / math.sqrt(channel))
    w2 = (jax.random.uniform(k2, (channel, cr), dtype=jnp.float32,
                             minval=-1.0, maxval=1.0) / math.sqrt(cr))

    # Case 1: spatial == dct size (no pooling branch).
    x_a = jax.random.normal(kx1, (n, channel, 7, 7), dtype=jnp.float32)
    out_a = jax.block_until_ready(
        multi_spectral_attention(x_a, freq_filters, w1, w2, dct_h, dct_w))
    ref_a = reference(x_a, dct_filter, w1, w2, dct_h, dct_w)
    assert out_a.shape == ref_a.shape == (n, channel, 7, 7)
    assert jnp.allclose(out_a, ref_a, atol=2e-4, rtol=2e-4), "mismatch (7x7)"

    # Case 2: spatial != dct size (adaptive pool folded into the DCT weights).
    x_b = jax.random.normal(kx2, (n, channel, 14, 14), dtype=jnp.float32)
    out_b = jax.block_until_ready(
        multi_spectral_attention(x_b, freq_filters, w1, w2, dct_h, dct_w))
    ref_b = reference(x_b, dct_filter, w1, w2, dct_h, dct_w)
    assert out_b.shape == ref_b.shape == (n, channel, 14, 14)
    assert jnp.allclose(out_b, ref_b, atol=2e-4, rtol=2e-4), "mismatch (14x14)"

    print("KERNEL_OK")
</pallas_src>

<mosaic_0001>
module attributes {stable_mosaic.version = 11 : i64} {
  func.func @_msa_kernel(%arg0: i32, %arg1: memref<1x32x49xf32, #tpu.memory_space<vmem>>, %arg2: memref<16x49xf32, #tpu.memory_space<vmem>>, %arg3: memref<32x16xf32, #tpu.memory_space<vmem>>, %arg4: memref<32x2xf32, #tpu.memory_space<vmem>>, %arg5: memref<2x32xf32, #tpu.memory_space<vmem>>, %arg6: memref<1x32x49xf32, #tpu.memory_space<vmem>>) attributes {dimension_semantics = [#tpu.dimension_semantics<parallel>], iteration_bounds = array<i64: 2>, scalar_prefetch = 0 : i64, scratch_operands = 0 : i64, tpu.core_type = #tpu.core_type<tc>, window_params = [{transform_indices = @transform_0, window_bounds = array<i64: 1, 32, 49>}, {pipeline_mode = #tpu.pipeline_mode<synchronous>, transform_indices = @transform_1, window_bounds = array<i64: 16, 49>}, {pipeline_mode = #tpu.pipeline_mode<synchronous>, transform_indices = @transform_2, window_bounds = array<i64: 32, 16>}, {pipeline_mode = #tpu.pipeline_mode<synchronous>, transform_indices = @transform_3, window_bounds = array<i64: 32, 2>}, {pipeline_mode = #tpu.pipeline_mode<synchronous>, transform_indices = @transform_4, window_bounds = array<i64: 2, 32>}, {transform_indices = @transform_5, window_bounds = array<i64: 1, 32, 49>}]} {
    %c0 = arith.constant 0 : index
    %c0_0 = arith.constant 0 : index
    %c0_1 = arith.constant 0 : index
    %0 = vector.load %arg1[%c0, %c0_0, %c0_1] : memref<1x32x49xf32, #tpu.memory_space<vmem>>, vector<1x32x49xf32>
    %1 = vector.shape_cast %0 : vector<1x32x49xf32> to vector<32x49xf32>
    %c0_2 = arith.constant 0 : index
    %c0_3 = arith.constant 0 : index
    %2 = vector.load %arg2[%c0_2, %c0_3] : memref<16x49xf32, #tpu.memory_space<vmem>>, vector<16x49xf32>
    %cst = arith.constant dense<0.000000e+00> : vector<32x16xf32>
    %3 = tpu.matmul %1, %2, %cst {dimension_numbers = #tpu.dot_dimension_numbers<[1], [1], [0], [0], [0, 0, 1, 0], [], []>} : vector<32x49xf32>, vector<16x49xf32>, vector<32x16xf32> -> vector<32x16xf32>
    %4 = vector.shape_cast %3 : vector<32x16xf32> to vector<1x32x16xf32>
    %c0_4 = arith.constant 0 : index
    %c0_5 = arith.constant 0 : index
    %5 = vector.load %arg3[%c0_4, %c0_5] : memref<32x16xf32, #tpu.memory_space<vmem>>, vector<32x16xf32>
    %6 = vector.shape_cast %5 : vector<32x16xf32> to vector<1x32x16xf32>
    %7 = arith.mulf %4, %6 : vector<1x32x16xf32>
    %cst_6 = arith.constant dense<0.000000e+00> : vector<1x32xf32>
    %8 = vector.multi_reduction <add>, %7, %cst_6 [2] : vector<1x32x16xf32> to vector<1x32xf32>
    %c0_7 = arith.constant 0 : index
    %c0_8 = arith.constant 0 : index
    %9 = vector.load %arg4[%c0_7, %c0_8] : memref<32x2xf32, #tpu.memory_space<vmem>>, vector<32x2xf32>
    %cst_9 = arith.constant dense<0.000000e+00> : vector<1x2xf32>
    %10 = tpu.matmul %8, %9, %cst_9 {dimension_numbers = #tpu.dot_dimension_numbers<[1], [0], [0], [1], [0, 0, 1, 1], [], []>} : vector<1x32xf32>, vector<32x2xf32>, vector<1x2xf32> -> vector<1x2xf32>
    %cst_10 = arith.constant 0.000000e+00 : f32
    %11 = vector.broadcast %cst_10 : f32 to vector<1x2xf32>
    %12 = arith.maximumf %10, %11 : vector<1x2xf32>
    %c0_11 = arith.constant 0 : index
    %c0_12 = arith.constant 0 : index
    %13 = vector.load %arg5[%c0_11, %c0_12] : memref<2x32xf32, #tpu.memory_space<vmem>>, vector<2x32xf32>
    %cst_13 = arith.constant dense<0.000000e+00> : vector<1x32xf32>
    %14 = tpu.matmul %12, %13, %cst_13 {dimension_numbers = #tpu.dot_dimension_numbers<[1], [0], [0], [1], [0, 0, 1, 1], [], []>} : vector<1x2xf32>, vector<2x32xf32>, vector<1x32xf32> -> vector<1x32xf32>
    %15 = arith.negf %14 : vector<1x32xf32>
    %16 = math.exp %15 : vector<1x32xf32>
    %cst_14 = arith.constant 1.000000e+00 : f32
    %17 = vector.broadcast %cst_14 : f32 to vector<1x32xf32>
    %18 = arith.addf %17, %16 : vector<1x32xf32>
    %19 = arith.divf %17, %18 : vector<1x32xf32>
    %20 = vector.shape_cast %19 : vector<1x32xf32> to vector<1x32x1xf32>
    %21 = vector.broadcast %20 : vector<1x32x1xf32> to vector<1x32x49xf32>
    %22 = arith.mulf %0, %21 : vector<1x32x49xf32>
    %c0_15 = arith.constant 0 : index
    %c0_16 = arith.constant 0 : index
    %c0_17 = arith.constant 0 : index
    %23 = vector.load %arg6[%c0_15, %c0_16, %c0_17] : memref<1x32x49xf32, #tpu.memory_space<vmem>>, vector<1x32x49xf32>
    tpu.vector_store %arg6[%c0_15, %c0_16, %c0_17], %22 {strides = array<i32>} : memref<1x32x49xf32, #tpu.memory_space<vmem>>, vector<1x32x49xf32>,
    return
  }
  func.func @transform_0(%arg0: i32) -> (i32, i32, i32) {
    %c0_i32 = arith.constant 0 : i32
    %c0_i32_0 = arith.constant 0 : i32
    %c0_i32_1 = arith.constant 0 : i32
    return %arg0, %c0_i32, %c0_i32_0 : i32, i32, i32
  }
  func.func @transform_1(%arg0: i32) -> (i32, i32) {
    %c0_i32 = arith.constant 0 : i32
    %c0_i32_0 = arith.constant 0 : i32
    %c0_i32_1 = arith.constant 0 : i32
    return %c0_i32, %c0_i32_0 : i32, i32
  }
  func.func @transform_2(%arg0: i32) -> (i32, i32) {
    %c0_i32 = arith.constant 0 : i32
    %c0_i32_0 = arith.constant 0 : i32
    %c0_i32_1 = arith.constant 0 : i32
    return %c0_i32, %c0_i32_0 : i32, i32
  }
  func.func @transform_3(%arg0: i32) -> (i32, i32) {
    %c0_i32 = arith.constant 0 : i32
    %c0_i32_0 = arith.constant 0 : i32
    %c0_i32_1 = arith.constant 0 : i32
    return %c0_i32, %c0_i32_0 : i32, i32
  }
  func.func @transform_4(%arg0: i32) -> (i32, i32) {
    %c0_i32 = arith.constant 0 : i32
    %c0_i32_0 = arith.constant 0 : i32
    %c0_i32_1 = arith.constant 0 : i32
    return %c0_i32, %c0_i32_0 : i32, i32
  }
  func.func @transform_5(%arg0: i32) -> (i32, i32, i32) {
    %c0_i32 = arith.constant 0 : i32
    %c0_i32_0 = arith.constant 0 : i32
    %c0_i32_1 = arith.constant 0 : i32
    return %arg0, %c0_i32, %c0_i32_0 : i32, i32, i32
  }
}

module attributes {stable_mosaic.version = 11 : i64} {
  func.func @_msa_kernel(%arg0: i32, %arg1: memref<1x32x49xf32, #tpu.memory_space<vmem>>, %arg2: memref<16x49xf32, #tpu.memory_space<vmem>>, %arg3: memref<32x16xf32, #tpu.memory_space<vmem>>, %arg4: memref<32x2xf32, #tpu.memory_space<vmem>>, %arg5: memref<2x32xf32, #tpu.memory_space<vmem>>, %arg6: memref<1x32x49xf32, #tpu.memory_space<vmem>>) attributes {dimension_semantics = [#tpu.dimension_semantics<parallel>], iteration_bounds = array<i64: 2>, scalar_prefetch = 0 : i64, scratch_operands = 0 : i64, tpu.core_type = #tpu.core_type<tc>, window_params = [{transform_indices = @transform_0, window_bounds = array<i64: 1, 32, 49>}, {pipeline_mode = #tpu.pipeline_mode<synchronous>, transform_indices = @transform_1, window_bounds = array<i64: 16, 49>}, {pipeline_mode = #tpu.pipeline_mode<synchronous>, transform_indices = @transform_2, window_bounds = array<i64: 32, 16>}, {pipeline_mode = #tpu.pipeline_mode<synchronous>, transform_indices = @transform_3, window_bounds = array<i64: 32, 2>}, {pipeline_mode = #tpu.pipeline_mode<synchronous>, transform_indices = @transform_4, window_bounds = array<i64: 2, 32>}, {transform_indices = @transform_5, window_bounds = array<i64: 1, 32, 49>}]} {
    %c0 = arith.constant 0 : index
    %c0_0 = arith.constant 0 : index
    %c0_1 = arith.constant 0 : index
    %0 = vector.load %arg1[%c0, %c0_0, %c0_1] : memref<1x32x49xf32, #tpu.memory_space<vmem>>, vector<1x32x49xf32>
    %1 = vector.shape_cast %0 : vector<1x32x49xf32> to vector<32x49xf32>
    %c0_2 = arith.constant 0 : index
    %c0_3 = arith.constant 0 : index
    %2 = vector.load %arg2[%c0_2, %c0_3] : memref<16x49xf32, #tpu.memory_space<vmem>>, vector<16x49xf32>
    %cst = arith.constant dense<0.000000e+00> : vector<32x16xf32>
    %3 = tpu.matmul %1, %2, %cst {dimension_numbers = #tpu.dot_dimension_numbers<[1], [1], [0], [0], [0, 0, 1, 0], [], []>} : vector<32x49xf32>, vector<16x49xf32>, vector<32x16xf32> -> vector<32x16xf32>
    %4 = vector.shape_cast %3 : vector<32x16xf32> to vector<1x32x16xf32>
    %c0_4 = arith.constant 0 : index
    %c0_5 = arith.constant 0 : index
    %5 = vector.load %arg3[%c0_4, %c0_5] : memref<32x16xf32, #tpu.memory_space<vmem>>, vector<32x16xf32>
    %6 = vector.shape_cast %5 : vector<32x16xf32> to vector<1x32x16xf32>
    %7 = arith.mulf %4, %6 : vector<1x32x16xf32>
    %cst_6 = arith.constant dense<0.000000e+00> : vector<1x32xf32>
    %8 = vector.multi_reduction <add>, %7, %cst_6 [2] : vector<1x32x16xf32> to vector<1x32xf32>
    %c0_7 = arith.constant 0 : index
    %c0_8 = arith.constant 0 : index
    %9 = vector.load %arg4[%c0_7, %c0_8] : memref<32x2xf32, #tpu.memory_space<vmem>>, vector<32x2xf32>
    %cst_9 = arith.constant dense<0.000000e+00> : vector<1x2xf32>
    %10 = tpu.matmul %8, %9, %cst_9 {dimension_numbers = #tpu.dot_dimension_numbers<[1], [0], [0], [1], [0, 0, 1, 1], [], []>} : vector<1x32xf32>, vector<32x2xf32>, vector<1x2xf32> -> vector<1x2xf32>
    %cst_10 = arith.constant 0.000000e+00 : f32
    %11 = vector.broadcast %cst_10 : f32 to vector<1x2xf32>
    %12 = arith.maximumf %10, %11 : vector<1x2xf32>
    %c0_11 = arith.constant 0 : index
    %c0_12 = arith.constant 0 : index
    %13 = vector.load %arg5[%c0_11, %c0_12] : memref<2x32xf32, #tpu.memory_space<vmem>>, vector<2x32xf32>
    %cst_13 = arith.constant dense<0.000000e+00> : vector<1x32xf32>
    %14 = tpu.matmul %12, %13, %cst_13 {dimension_numbers = #tpu.dot_dimension_numbers<[1], [0], [0], [1], [0, 0, 1, 1], [], []>} : vector<1x2xf32>, vector<2x32xf32>, vector<1x32xf32> -> vector<1x32xf32>
    %15 = arith.negf %14 : vector<1x32xf32>
    %16 = math.exp %15 : vector<1x32xf32>
    %cst_14 = arith.constant 1.000000e+00 : f32
    %17 = vector.broadcast %cst_14 : f32 to vector<1x32xf32>
    %18 = arith.addf %17, %16 : vector<1x32xf32>
    %19 = arith.divf %17, %18 : vector<1x32xf32>
    %20 = vector.shape_cast %19 : vector<1x32xf32> to vector<1x32x1xf32>
    %21 = vector.broadcast %20 : vector<1x32x1xf32> to vector<1x32x49xf32>
    %22 = arith.mulf %0, %21 : vector<1x32x49xf32>
    %c0_15 = arith.constant 0 : index
    %c0_16 = arith.constant 0 : index
    %c0_17 = arith.constant 0 : index
    %23 = vector.load %arg6[%c0_15, %c0_16, %c0_17] : memref<1x32x49xf32, #tpu.memory_space<vmem>>, vector<1x32x49xf32>
    tpu.vector_store %arg6[%c0_15, %c0_16, %c0_17], %22 {strides = array<i32>} : memref<1x32x49xf32, #tpu.memory_space<vmem>>, vector<1x32x49xf32>,
    return
  }
  func.func @transform_0(%arg0: i32) -> (i32, i32, i32) {
    %c0_i32 = arith.constant 0 : i32
    %c0_i32_0 = arith.constant 0 : i32
    %c0_i32_1 = arith.constant 0 : i32
    return %arg0, %c0_i32, %c0_i32_0 : i32, i32, i32
  }
  func.func @transform_1(%arg0: i32) -> (i32, i32) {
    %c0_i32 = arith.constant 0 : i32
    %c0_i32_0 = arith.constant 0 : i32
    %c0_i32_1 = arith.constant 0 : i32
    return %c0_i32, %c0_i32_0 : i32, i32
  }
  func.func @transform_2(%arg0: i32) -> (i32, i32) {
    %c0_i32 = arith.constant 0 : i32
    %c0_i32_0 = arith.constant 0 : i32
    %c0_i32_1 = arith.constant 0 : i32
    return %c0_i32, %c0_i32_0 : i32, i32
  }
  func.func @transform_3(%arg0: i32) -> (i32, i32) {
    %c0_i32 = arith.constant 0 : i32
    %c0_i32_0 = arith.constant 0 : i32
    %c0_i32_1 = arith.constant 0 : i32
    return %c0_i32, %c0_i32_0 : i32, i32
  }
  func.func @transform_4(%arg0: i32) -> (i32, i32) {
    %c0_i32 = arith.constant 0 : i32
    %c0_i32_0 = arith.constant 0 : i32
    %c0_i32_1 = arith.constant 0 : i32
    return %c0_i32, %c0_i32_0 : i32, i32
  }
  func.func @transform_5(%arg0: i32) -> (i32, i32, i32) {
    %c0_i32 = arith.constant 0 : i32
    %c0_i32_0 = arith.constant 0 : i32
    %c0_i32_1 = arith.constant 0 : i32
    return %arg0, %c0_i32, %c0_i32_0 : i32, i32, i32
  }
}

</mosaic_0001>

<bundles_post_ra>
// kernel: tpu_custom_call.1
= control target key start
LH: loop header
LB: loop body
LE: loop exit
PB: predicated region body
PF: predicated region fallthrough
CT: control target
= control target key end

     0   :  { %10 = vsyncpa [#allocation3], 0  ;;  %s1038_s0 = inlined_call_operand.vmem [shape: f32[2,32,49], index: 0, kind: input, shape index: {}]   ;;  %s1039_s1 = inlined_call_operand.vmem [shape: f32[16,49], index: 1, kind: input, shape index: {}]   ;;  %s1040_s2 = inlined_call_operand.vmem [shape: f32[32,16], index: 2, kind: input, shape index: {}]   ;;  %s1041_s3 = inlined_call_operand.vmem [shape: f32[32,2], index: 3, kind: input, shape index: {}]   ;;  %s1042_s4 = inlined_call_operand.vmem [shape: f32[2,32], index: 4, kind: input, shape index: {}]   ;;  %s1043_s5 = inlined_call_operand.hbm [shape: f32[2,32,49], index: 5, kind: output, shape index: {}]  }
   0x1   :  { %12 = vsyncpa [#allocation3 + $0x1], 0  ;;  %s874_s18 = smov 0   ;;  %s876_s19 = smov 0  }
   0x2   :  { %s878_s20 = smov 0   ;;  %s880_s21 = smov 0  }
   0x3 LB: > { %s895_s22 = sadd.s32 4294967295, %s836_s21   ;;  %s651_s23 = sadd.s32 4294967294, %s836_s21   ;;  %s836_s21 = sphi %s880_s21, %s1049_s21   ;;  %s832_s20 = sphi %s878_s20, %s1048_s20   ;;  %s828_s19 = sphi %s876_s19, %s1047_s19   ;;  %s824_s18 = sphi %s874_s18, %s1046_s18  }
   0x4   : > { %s899_s24 = sadd.s32 1, %s836_s21   ;;  %s135_s25 = sadd.s32 1, %s832_s20 }
   0x5   : > { %s132_s26 = ssub.s32 %s836_s21, %s899_s24  ;;  %p145_p0 = scmp.ne.s32.totalorder %s832_s20, %s828_s19 }
   0x6   : > { %p133_p1 = scmp.eq.s32.totalorder %s132_s26, 0  ;;  %p146_p2 = scmp.eq.s32.totalorder %s895_s22, 1 }
   0x7   : > { %p151_p3 = scmp.ne.s32.totalorder %s828_s19, %s824_s18  ;;  %p152_p4 = scmp.eq.s32.totalorder %s651_s23, 1 }
   0x8   : > { %s910_s27 = scalar_select %p133_p1, %s832_s20, %s135_s25  }
   0x9   : > { %p912_p5 = por %p146_p2, %p145_p0  ;;  %p916_p6 = por %p152_p4, %p151_p3 }
   0xa   : > { %p654_p7 = scmp.ge.s32.totalorder %s836_s21, 1  ;;  %p190_p8 = scmp.lt.s32.totalorder %s836_s21, 3 }
   0xc   : > { %p191_p9 = pnand %p654_p7, %p190_p8 }
   0xd   : > { %v227_v0 = vld [vmem:[%s1039_s1] sm:$0xff] (!%p191_p9)  ;;  %v228_v1 = vld [vmem:[%s1039_s1 + $0x8] sm:$0xff] (!%p191_p9)  ;;  %vm229_vm0 = vcmask (!%p191_p9), 400384   ;;  %p218_p10 = scmp.lt.s32.totalorder (!%p191_p9), %s895_s22, 1  ;;  %vm341_vm2 = vcmask (!%p191_p9), 130048   ;;  %v335_v12 = vld [vmem:[%s1040_s2 + $0x10] sm:$0xff] (!%p191_p9)  ;;  %v362_v31 = vlaneseq (!%p191_p9) }
   0xe   : > { %194 = sbr.rel (%p191_p9) target bundleno = 990 (0x3de), region = 40  ;;  %v714_v2 = vpack.c.bf16 (!%p191_p9), %v228_v1, %v227_v0  ;;  %vm715_vm1 = vmpackc.low (!%p191_p9), %vm229_vm0, %vm229_vm0  ;;  %v333_v7 = vld [vmem:[%s1040_s2] sm:$0xff] (!%p191_p9)  ;;  %v334_v9 = vld [vmem:[%s1040_s2 + $0x8] sm:$0xff] (!%p191_p9)  ;;  %v838_v23 = vmov (!%p191_p9), 0.0|0.0   ;;  %vm839_vm3 = vmmov (!%p191_p9), 0   ;;  %v840_v30 = vmov (!%p191_p9), 0.0  }
   0xf   : > { %v336_v16 = vld [vmem:[%s1040_s2 + $0x18] sm:$0xff] (!%p191_p9)  ;;  %720 = vmatprep.subr.bf16.mxu1 (!%p191_p9), %v838_v23  ;;  %v354_v24 = vld [vmem:[%s1041_s3] sm:$0xff] (!%p191_p9)  ;;  %v355_v25 = vld [vmem:[%s1041_s3 + $0x8] sm:$0xff] (!%p191_p9)  ;;  %706 = vmatprep.mubr.msk.f32.mxu1 (!%p191_p9), %vm839_vm3, %v840_v30  ;;  %v363_v32 = vand.u32 (!%p191_p9), 127, %v362_v31  ;;  %v365_v33 = vshrl.u32 (!%p191_p9), %v362_v31, 7  ;;  %vm373_vm4 = vcmask (!%p191_p9), 130112  }
  0x10   : > { %716 = vmatprep.subr.msk.bf16.mxu0 (!%p191_p9), %vm715_vm1, %v714_v2  ;;  %v721_v26 = vpack.c.bf16 (!%p191_p9), %v355_v25, %v354_v24  ;;  %v356_v27 = vld [vmem:[%s1041_s3 + $0x10] sm:$0xff] (!%p191_p9)  ;;  %v357_v28 = vld [vmem:[%s1041_s3 + $0x18] sm:$0xff] (!%p191_p9)  ;;  %vm380_vm5 = vcmask (!%p191_p9), 195712   ;;  %vm387_vm6 = vcmask (!%p191_p9), 261312   ;;  %vm389_vm7 = vcmask (!%p191_p9), 261120   ;;  %s215_s16 = sand.u32 (!%p191_p9), 1, %s828_s19  }
  0x11   : > { %719 = vmatpush3.bf16.xpose.msk.msra.mxu0 (!%p191_p9), %vm715_vm1, %v714_v2  ;;  %v724_v29 = vpack.c.bf16 (!%p191_p9), %v357_v28, %v356_v27  ;;  %v368_v34 = vadd.s32 (!%p191_p9), 4294967288, %v363_v32  ;;  %v375_v35 = vadd.s32 (!%p191_p9), 4294967280, %v363_v32  ;;  %v366_v37 = vsub.s32 (!%p191_p9), %v363_v32, %v365_v33  ;;  %v463_v51 = vld [vmem:[%s1042_s4] sm:$0x3] (!%p191_p9)  ;;  %s655_s17 = sshll.u32 (!%p191_p9), %s215_s16, 5  ;;  %s674_s26 = sshll.u32 (!%p191_p9), %s895_s22, 9 }
  0x12   : > { %722 = vmatpush3.bf16.msra.mxu1 (!%p191_p9), %v721_v26  ;;  %v382_v39 = vadd.s32 (!%p191_p9), 4294967272, %v363_v32  ;;  %vm468_vm8 = vcmask (!%p191_p9), 1041408   ;;  %vm464_vm9 = vcmask (!%p191_p9), 15360   ;;  %v550_v61 = vsub.s32 (!%p191_p9), 0, %v365_v33  ;;  %s217_s23 = scalar_lea.vmem (!%p191_p9), [#allocation2], %s655_s17  ;;  %s993_s7 = scalar_lea.hbm (!%p191_p9), %s1043_s5, %s674_s26 }
  0x13   : > { %723 = vmatprep.subr.bf16.mxu1 (!%p191_p9), %v838_v23  ;;  %v371_v38 = vsub.s32 (!%p191_p9), %v368_v34, %v365_v33  ;;  %v378_v40 = vsub.s32 (!%p191_p9), %v375_v35, %v365_v33  ;;  %s589_s25 = sshll.u32 (!%p191_p9), %s217_s23, 4  ;;  %s997_s8 = scalar_lea.sflag (!%p191_p9), [#allocation3], %s215_s16  ;;  %s988_s25 = int_to_ptr.vmem [resolvable:$true] %s589_s25 }
  0x14   : > { %v385_v45 = vsub.s32 (!%p191_p9), %v382_v39, %v365_v33 }
  0x15   : > { %s219_s9 = scalar_select %p218_p10, %s895_s22, 1 }
  0x16   : > { %725 = vmatpush3.bf16.msra.mxu1 %v724_v29  ;;  %s774_s22 = scalar_lea.vmem %s988_s25, 512 }
  0x17   : > { %s673_s10 = sshll.u32 %s219_s9, 5  ;;  %709 = vmatprep.subr.mxu1 %v840_v30  ;;  %p775_p11 = scmp.ne.s32.totalorder %s988_s25, %s774_s22 }
  0x18   : > { %s222_s13 = scalar_lea.vmem %s1038_s0, %s673_s10  ;;  %s841_s9 = smov [#allocation2]  }
  0x19   : > { %v935_v3 = vld [vmem:[%s222_s13] sm:$0xff]  ;;  %v939_v4 = vld [vmem:[%s222_s13 + $0x8] sm:$0xff]  ;;  %v941_v5 = vld [vmem:[%s222_s13 + $0x10] sm:$0xff]  ;;  %p776_p12 = pnand %p775_p11, %p912_p5  ;;  %s778_s10 = sshll.u32 %s841_s9, 4  ;;  %s779_s10 = int_to_ptr.vmem [resolvable:$false] %s778_s10 }
  0x1a   : > { %692 = vmatprep.mubr.msk.f32.mxu0 %vm229_vm0, %v935_v3  ;;  %v947_v6 = vld [vmem:[%s222_s13 + $0x18] sm:$0xff]  ;;  %s780_s11 = scalar_lea.vmem %s779_s10, 1024  ;;  %p781_p0 = scmp.lt.s32.totalorder %s988_s25, %s779_s10 }
  0x1b   : > { %693 = vmatmul.mubr.msk.f32.vlgmr.msra.gmra.mrb[0].mxu0 %vm229_vm0, %v939_v4  ;;  %p777_p13 = pneg %p776_p12  ;;  %p782_p1 = scmp.lt.s32.totalorder %s780_s11, %s774_s22 }
  0x1c   : > { %695 = vmatprep.mubr.msk.f32.mxu0 %vm229_vm0, %v941_v5 }
  0x1d   : > { %p783_p2 = por %p782_p1, %p781_p0 }
  0x1f   : > { %696 = vmatmul.mubr.msk.f32.gmra.mrb[2].mxu0 %vm229_vm0, %v947_v6  ;;  %p784_p3 = pnand %p783_p2, %p777_p13 }
  0xee   : > { %v694_v8 = vpop.f32.mrb[0].mxu0 }
  0xef   : > { %v314_v10 = vpop.f32.mrb[1].mxu0  ;;  %v338_v13 = vmul.f32 %v694_v8, %v334_v9 }
  0xf0   : > { %v337_v11 = vmul.f32 %v333_v7, %v314_v10 }
  0xf1   : > { %v345_v20 = vsel %vm341_vm2, %v338_v13, 0.0 }
  0xf2   : > { %v697_v14 = vpop.f32.mrb[2].mxu0  ;;  %v342_v15 = vsel %vm341_vm2, %v337_v11, 0.0 }
  0xf3   : > { %343 = vadd.xlane.f32.xlu0 %v342_v15  ;;  %v324_v17 = vpop.f32.mrb[3].mxu0  ;;  %v340_v19 = vmul.f32 %v697_v14, %v336_v16 }
  0xf4   : > { %v339_v18 = vmul.f32 %v335_v12, %v324_v17 }
  0xf5   : > { %v351_v22 = vsel %vm341_vm2, %v340_v19, 0.0 }
  0xf6   : > { %v348_v21 = vsel %vm341_vm2, %v339_v18, 0.0 }
  0xf7   : > { %346 = vadd.xlane.f32.xlu0 %v345_v20  ;;  %349 = vadd.xlane.f32.xlu1 %v348_v21 }
  0xfb   : > { %352 = vadd.xlane.f32.xlu1 %v351_v22 }
 0x180   : > { %v344_v36 = vpop.xlane.xlu0 %343 }
 0x181   : > { %v367_v43 = vrot.slane %v344_v36, %v366_v37 }
 0x184   : > { %v347_v41 = vpop.xlane.xlu0 %346  ;;  %v350_v42 = vpop.xlane.xlu1 %349 }
 0x185   : > { %v372_v44 = vrot.slane %v347_v41, %v371_v38  ;;  %v379_v46 = vrot.slane %v350_v42, %v378_v40 }
 0x187   : > { %v374_v47 = vsel %vm373_vm4, %v372_v44, %v367_v43 }
 0x188   : > { %v353_v48 = vpop.xlane.xlu1 %352  ;;  %v381_v50 = vsel %vm380_vm5, %v379_v46, %v374_v47 }
 0x189   : > { %v386_v49 = vrot.slane %v353_v48, %v385_v45 }
 0x18b   : > { %v388_v52 = vsel %vm387_vm6, %v386_v49, %v381_v50 }
 0x18c   : > { %707 = vmatmul.mubr.msk.f32.vlgmr.msra.gmra.mrb[0].mxu1 %vm389_vm7, %v388_v52 }
 0x18d   : > { %710 = vmatpush3.msk.msra.mxu1 %vm468_vm8, %v463_v51  ;;  %711 = vmatprep.mubr.msk.f32.mxu1 %vm839_vm3, %v840_v30 }
 0x25f   : > { %v458_v53 = vpop.f32.mrb[0].mxu1 }
 0x260   : > { %v462_v54 = vmax.f32 %v458_v53, 0.0  ;;  %v708_v55 = vpop.f32.mrb[1].mxu1 }
 0x262   : > { %712 = vmatmul.mubr.msk.f32.vlgmr.msra.gmra.mrb[2].mxu1 %vm464_vm9, %v462_v54 }
 0x335   : > { %v538_v56 = vpop.f32.mrb[2].mxu1 }
 0x336   : > { %v667_v57 = vmul.f32 -1.442695, %v538_v56  ;;  %v713_v58 = vpop.f32.mrb[3].mxu1 }
 0x338   : > { %770 = vpow2.f32 %v667_v57 }
 0x342   : > { %v771_v59 = vpop.eup %770 }
 0x343   : > { %v545_v60 = vadd.f32 1.0, %v771_v59 }
 0x345   : > { %772 = vrcp.f32 %v545_v60 }
 0x34f   : > { %v773_v62 = vpop.eup %772 }
 0x350   : > { %v551_v63 = vrot.slane %v773_v62, %v550_v61 }
 0x352   : > { %557 = vbcast.lane.b32.xlu1 %v551_v63, 264  ;;  %553 = vbcast.lane.b32.xlu0 %v551_v63, 256 }
 0x356   : > { %561 = vbcast.lane.b32.xlu1 %v551_v63, 272 }
 0x35a   : > { %565 = vbcast.lane.b32.xlu1 %v551_v63, 280 }
 0x3c4   : > { %v558_v0 = vpop.permute.xlu1 %557  ;;  %v554_v1 = vpop.permute.xlu0 %553 }
 0x3c5   : > { %v568_v2 = vmul.f32 %v558_v0, %v939_v4  ;;  %v567_v7 = vmul.f32 %v554_v1, %v935_v3 }
 0x3c7   : > { %572 = vst.msk [vmem:[%s217_s23 + $0x8] sm:$0xff] %vm229_vm0, %v568_v2  ;;  %571 = vst.msk [vmem:[%s217_s23] sm:$0xff] %vm229_vm0, %v567_v7 }
 0x3c8   : > { %v562_v8 = vpop.permute.xlu1 %561 }
 0x3c9   : > { %v569_v9 = vmul.f32 %v562_v8, %v941_v5 }
 0x3cb   : > { %573 = vst.msk [vmem:[%s217_s23 + $0x10] sm:$0xff] %vm229_vm0, %v569_v9 }
 0x3cc   : > { %v566_v4 = vpop.permute.xlu1 %565 }
 0x3cd   : > { %v570_v3 = vmul.f32 %v566_v4, %v947_v6 }
 0x3cf   : > { %574 = vst.msk [vmem:[%s217_s23 + $0x18] sm:$0xff] %vm229_vm0, %v570_v3 }
 0x3d0   : > { %787 = shalt.err (!%p784_p3)
}
 0x3d1   : > { %s788_s12 = scalar_lea.hbm %s993_s7, 512  ;;  %s792_s15 = scalar_lea.hbm %s1043_s5, 1024 }
 0x3d2   : > { %p789_p4 = scmp.ne.s32.totalorder %s993_s7, %s788_s12  ;;  %p793_p9 = scmp.lt.u32.totalorder %s993_s7, %s1043_s5 }
 0x3d3   : > { %p794_p10 = scmp.lt.u32.totalorder %s792_s15, %s788_s12  ;;  %p796_p12 = scmp.lt.u32.totalorder %s788_s12, %s993_s7 }
 0x3d4   : > { %p790_p7 = pnand %p789_p4, %p912_p5 }
 0x3d5   : > { %p795_p11 = por %p794_p10, %p793_p9 }
 0x3d6   : > { %p791_p8 = pneg %p790_p7 }
 0x3d7   : > { %p797_p13 = por %p796_p12, %p795_p11 }
 0x3d9   : > { %p798_p0 = pnand %p797_p13, %p791_p8 }
 0x3db   : > { %801 = shalt.err (!%p798_p0)
}
 0x3dc   : > { %s842_s23 = smov 128   ;;  %s843_s26 = smov 8  }
 0x3dd   : > { %726 = dma.vmem_to_hbm [thread:$0]  (%p912_p5), %s988_s25, 512, %s993_s7, %s997_s8, %s842_s23, %s842_s23, %s843_s26  }
 0x3de PF: > { %p732_p1 = scmp.ge.s32.totalorder %s836_s21, 2  ;;  %s604_s30 = sand.u32 1, %s824_s18  }
 0x3df   : > { %s605_s6 = scalar_lea.sflag [#allocation3], %s604_s30 }
 0x3e0   : > { %p729_p2 = pnand %p732_p1, %p916_p6 }
 0x3e2   : > { %819 = dma.done.wait (!%p729_p2), %s605_s6, 512  }
 0x3e3   : > { %821 = vsyncadd (!%p729_p2), %s605_s6, 4294966784  ;;  %p15_p3 = scmp.ge.s32.totalorder %s899_s24, 4   ;;  %s1046_s18 = smov %s828_s19 }
 0x3e4   : > { %s1047_s19 = smov %s832_s20  ;;  %s1048_s20 = smov %s910_s27 }
 0x3e5   : > { %s1049_s21 = smov %s899_s24  ;;  %17 = sbr.rel (!%p15_p3) target bundleno = 3 (0x3), region = 75 }
 0x3ec   :  { %610 = vsyncpa [#allocation3], 1 }
 0x3ed   :  { %612 = vsyncpa [#allocation3 + $0x1], 1 }

// kernel: tpu_custom_call.1
= control target key start
LH: loop header
LB: loop body
LE: loop exit
PB: predicated region body
PF: predicated region fallthrough
CT: control target
= control target key end

     0   :  { %10 = vsyncpa [#allocation3], 0  ;;  %s1038_s0 = inlined_call_operand.vmem [shape: f32[2,32,49], index: 0, kind: input, shape index: {}]   ;;  %s1039_s1 = inlined_call_operand.vmem [shape: f32[16,49], index: 1, kind: input, shape index: {}]   ;;  %s1040_s2 = inlined_call_operand.vmem [shape: f32[32,16], index: 2, kind: input, shape index: {}]   ;;  %s1041_s3 = inlined_call_operand.vmem [shape: f32[32,2], index: 3, kind: input, shape index: {}]   ;;  %s1042_s4 = inlined_call_operand.vmem [shape: f32[2,32], index: 4, kind: input, shape index: {}]   ;;  %s1043_s5 = inlined_call_operand.hbm [shape: f32[2,32,49], index: 5, kind: output, shape index: {}]  }
   0x1   :  { %12 = vsyncpa [#allocation3 + $0x1], 0  ;;  %s874_s18 = smov 0   ;;  %s876_s19 = smov 0  }
   0x2   :  { %s878_s20 = smov 0   ;;  %s880_s21 = smov 0  }
   0x3 LB: > { %s895_s22 = sadd.s32 4294967295, %s836_s21   ;;  %s651_s23 = sadd.s32 4294967294, %s836_s21   ;;  %s836_s21 = sphi %s880_s21, %s1049_s21   ;;  %s832_s20 = sphi %s878_s20, %s1048_s20   ;;  %s828_s19 = sphi %s876_s19, %s1047_s19   ;;  %s824_s18 = sphi %s874_s18, %s1046_s18  }
   0x4   : > { %s899_s24 = sadd.s32 1, %s836_s21   ;;  %s135_s25 = sadd.s32 1, %s832_s20 }
   0x5   : > { %s132_s26 = ssub.s32 %s836_s21, %s899_s24  ;;  %p145_p0 = scmp.ne.s32.totalorder %s832_s20, %s828_s19 }
   0x6   : > { %p133_p1 = scmp.eq.s32.totalorder %s132_s26, 0  ;;  %p146_p2 = scmp.eq.s32.totalorder %s895_s22, 1 }
   0x7   : > { %p151_p3 = scmp.ne.s32.totalorder %s828_s19, %s824_s18  ;;  %p152_p4 = scmp.eq.s32.totalorder %s651_s23, 1 }
   0x8   : > { %s910_s27 = scalar_select %p133_p1, %s832_s20, %s135_s25  }
   0x9   : > { %p912_p5 = por %p146_p2, %p145_p0  ;;  %p916_p6 = por %p152_p4, %p151_p3 }
   0xa   : > { %p654_p7 = scmp.ge.s32.totalorder %s836_s21, 1  ;;  %p190_p8 = scmp.lt.s32.totalorder %s836_s21, 3 }
   0xc   : > { %p191_p9 = pnand %p654_p7, %p190_p8 }
   0xd   : > { %v227_v0 = vld [vmem:[%s1039_s1] sm:$0xff] (!%p191_p9)  ;;  %v228_v1 = vld [vmem:[%s1039_s1 + $0x8] sm:$0xff] (!%p191_p9)  ;;  %vm229_vm0 = vcmask (!%p191_p9), 400384   ;;  %p218_p10 = scmp.lt.s32.totalorder (!%p191_p9), %s895_s22, 1  ;;  %vm341_vm2 = vcmask (!%p191_p9), 130048   ;;  %v335_v12 = vld [vmem:[%s1040_s2 + $0x10] sm:$0xff] (!%p191_p9)  ;;  %v362_v31 = vlaneseq (!%p191_p9) }
   0xe   : > { %194 = sbr.rel (%p191_p9) target bundleno = 990 (0x3de), region = 40  ;;  %v714_v2 = vpack.c.bf16 (!%p191_p9), %v228_v1, %v227_v0  ;;  %vm715_vm1 = vmpackc.low (!%p191_p9), %vm229_vm0, %vm229_vm0  ;;  %v333_v7 = vld [vmem:[%s1040_s2] sm:$0xff] (!%p191_p9)  ;;  %v334_v9 = vld [vmem:[%s1040_s2 + $0x8] sm:$0xff] (!%p191_p9)  ;;  %v838_v23 = vmov (!%p191_p9), 0.0|0.0   ;;  %vm839_vm3 = vmmov (!%p191_p9), 0   ;;  %v840_v30 = vmov (!%p191_p9), 0.0  }
   0xf   : > { %v336_v16 = vld [vmem:[%s1040_s2 + $0x18] sm:$0xff] (!%p191_p9)  ;;  %720 = vmatprep.subr.bf16.mxu1 (!%p191_p9), %v838_v23  ;;  %v354_v24 = vld [vmem:[%s1041_s3] sm:$0xff] (!%p191_p9)  ;;  %v355_v25 = vld [vmem:[%s1041_s3 + $0x8] sm:$0xff] (!%p191_p9)  ;;  %706 = vmatprep.mubr.msk.f32.mxu1 (!%p191_p9), %vm839_vm3, %v840_v30  ;;  %v363_v32 = vand.u32 (!%p191_p9), 127, %v362_v31  ;;  %v365_v33 = vshrl.u32 (!%p191_p9), %v362_v31, 7  ;;  %vm373_vm4 = vcmask (!%p191_p9), 130112  }
  0x10   : > { %716 = vmatprep.subr.msk.bf16.mxu0 (!%p191_p9), %vm715_vm1, %v714_v2  ;;  %v721_v26 = vpack.c.bf16 (!%p191_p9), %v355_v25, %v354_v24  ;;  %v356_v27 = vld [vmem:[%s1041_s3 + $0x10] sm:$0xff] (!%p191_p9)  ;;  %v357_v28 = vld [vmem:[%s1041_s3 + $0x18] sm:$0xff] (!%p191_p9)  ;;  %vm380_vm5 = vcmask (!%p191_p9), 195712   ;;  %vm387_vm6 = vcmask (!%p191_p9), 261312   ;;  %vm389_vm7 = vcmask (!%p191_p9), 261120   ;;  %s215_s16 = sand.u32 (!%p191_p9), 1, %s828_s19  }
  0x11   : > { %719 = vmatpush3.bf16.xpose.msk.msra.mxu0 (!%p191_p9), %vm715_vm1, %v714_v2  ;;  %v724_v29 = vpack.c.bf16 (!%p191_p9), %v357_v28, %v356_v27  ;;  %v368_v34 = vadd.s32 (!%p191_p9), 4294967288, %v363_v32  ;;  %v375_v35 = vadd.s32 (!%p191_p9), 4294967280, %v363_v32  ;;  %v366_v37 = vsub.s32 (!%p191_p9), %v363_v32, %v365_v33  ;;  %v463_v51 = vld [vmem:[%s1042_s4] sm:$0x3] (!%p191_p9)  ;;  %s655_s17 = sshll.u32 (!%p191_p9), %s215_s16, 5  ;;  %s674_s26 = sshll.u32 (!%p191_p9), %s895_s22, 9 }
  0x12   : > { %722 = vmatpush3.bf16.msra.mxu1 (!%p191_p9), %v721_v26  ;;  %v382_v39 = vadd.s32 (!%p191_p9), 4294967272, %v363_v32  ;;  %vm468_vm8 = vcmask (!%p191_p9), 1041408   ;;  %vm464_vm9 = vcmask (!%p191_p9), 15360   ;;  %v550_v61 = vsub.s32 (!%p191_p9), 0, %v365_v33  ;;  %s217_s23 = scalar_lea.vmem (!%p191_p9), [#allocation2], %s655_s17  ;;  %s993_s7 = scalar_lea.hbm (!%p191_p9), %s1043_s5, %s674_s26 }
  0x13   : > { %723 = vmatprep.subr.bf16.mxu1 (!%p191_p9), %v838_v23  ;;  %v371_v38 = vsub.s32 (!%p191_p9), %v368_v34, %v365_v33  ;;  %v378_v40 = vsub.s32 (!%p191_p9), %v375_v35, %v365_v33  ;;  %s589_s25 = sshll.u32 (!%p191_p9), %s217_s23, 4  ;;  %s997_s8 = scalar_lea.sflag (!%p191_p9), [#allocation3], %s215_s16  ;;  %s988_s25 = int_to_ptr.vmem [resolvable:$true] %s589_s25 }
  0x14   : > { %v385_v45 = vsub.s32 (!%p191_p9), %v382_v39, %v365_v33 }
  0x15   : > { %s219_s9 = scalar_select %p218_p10, %s895_s22, 1 }
  0x16   : > { %725 = vmatpush3.bf16.msra.mxu1 %v724_v29  ;;  %s774_s22 = scalar_lea.vmem %s988_s25, 512 }
  0x17   : > { %s673_s10 = sshll.u32 %s219_s9, 5  ;;  %709 = vmatprep.subr.mxu1 %v840_v30  ;;  %p775_p11 = scmp.ne.s32.totalorder %s988_s25, %s774_s22 }
  0x18   : > { %s222_s13 = scalar_lea.vmem %s1038_s0, %s673_s10  ;;  %s841_s9 = smov [#allocation2]  }
  0x19   : > { %v935_v3 = vld [vmem:[%s222_s13] sm:$0xff]  ;;  %v939_v4 = vld [vmem:[%s222_s13 + $0x8] sm:$0xff]  ;;  %v941_v5 = vld [vmem:[%s222_s13 + $0x10] sm:$0xff]  ;;  %p776_p12 = pnand %p775_p11, %p912_p5  ;;  %s778_s10 = sshll.u32 %s841_s9, 4  ;;  %s779_s10 = int_to_ptr.vmem [resolvable:$false] %s778_s10 }
  0x1a   : > { %692 = vmatprep.mubr.msk.f32.mxu0 %vm229_vm0, %v935_v3  ;;  %v947_v6 = vld [vmem:[%s222_s13 + $0x18] sm:$0xff]  ;;  %s780_s11 = scalar_lea.vmem %s779_s10, 1024  ;;  %p781_p0 = scmp.lt.s32.totalorder %s988_s25, %s779_s10 }
  0x1b   : > { %693 = vmatmul.mubr.msk.f32.vlgmr.msra.gmra.mrb[0].mxu0 %vm229_vm0, %v939_v4  ;;  %p777_p13 = pneg %p776_p12  ;;  %p782_p1 = scmp.lt.s32.totalorder %s780_s11, %s774_s22 }
  0x1c   : > { %695 = vmatprep.mubr.msk.f32.mxu0 %vm229_vm0, %v941_v5 }
  0x1d   : > { %p783_p2 = por %p782_p1, %p781_p0 }
  0x1f   : > { %696 = vmatmul.mubr.msk.f32.gmra.mrb[2].mxu0 %vm229_vm0, %v947_v6  ;;  %p784_p3 = pnand %p783_p2, %p777_p13 }
  0xee   : > { %v694_v8 = vpop.f32.mrb[0].mxu0 }
  0xef   : > { %v314_v10 = vpop.f32.mrb[1].mxu0  ;;  %v338_v13 = vmul.f32 %v694_v8, %v334_v9 }
  0xf0   : > { %v337_v11 = vmul.f32 %v333_v7, %v314_v10 }
  0xf1   : > { %v345_v20 = vsel %vm341_vm2, %v338_v13, 0.0 }
  0xf2   : > { %v697_v14 = vpop.f32.mrb[2].mxu0  ;;  %v342_v15 = vsel %vm341_vm2, %v337_v11, 0.0 }
  0xf3   : > { %343 = vadd.xlane.f32.xlu0 %v342_v15  ;;  %v324_v17 = vpop.f32.mrb[3].mxu0  ;;  %v340_v19 = vmul.f32 %v697_v14, %v336_v16 }
  0xf4   : > { %v339_v18 = vmul.f32 %v335_v12, %v324_v17 }
  0xf5   : > { %v351_v22 = vsel %vm341_vm2, %v340_v19, 0.0 }
  0xf6   : > { %v348_v21 = vsel %vm341_vm2, %v339_v18, 0.0 }
  0xf7   : > { %346 = vadd.xlane.f32.xlu0 %v345_v20  ;;  %349 = vadd.xlane.f32.xlu1 %v348_v21 }
  0xfb   : > { %352 = vadd.xlane.f32.xlu1 %v351_v22 }
 0x180   : > { %v344_v36 = vpop.xlane.xlu0 %343 }
 0x181   : > { %v367_v43 = vrot.slane %v344_v36, %v366_v37 }
 0x184   : > { %v347_v41 = vpop.xlane.xlu0 %346  ;;  %v350_v42 = vpop.xlane.xlu1 %349 }
 0x185   : > { %v372_v44 = vrot.slane %v347_v41, %v371_v38  ;;  %v379_v46 = vrot.slane %v350_v42, %v378_v40 }
 0x187   : > { %v374_v47 = vsel %vm373_vm4, %v372_v44, %v367_v43 }
 0x188   : > { %v353_v48 = vpop.xlane.xlu1 %352  ;;  %v381_v50 = vsel %vm380_vm5, %v379_v46, %v374_v47 }
 0x189   : > { %v386_v49 = vrot.slane %v353_v48, %v385_v45 }
 0x18b   : > { %v388_v52 = vsel %vm387_vm6, %v386_v49, %v381_v50 }
 0x18c   : > { %707 = vmatmul.mubr.msk.f32.vlgmr.msra.gmra.mrb[0].mxu1 %vm389_vm7, %v388_v52 }
 0x18d   : > { %710 = vmatpush3.msk.msra.mxu1 %vm468_vm8, %v463_v51  ;;  %711 = vmatprep.mubr.msk.f32.mxu1 %vm839_vm3, %v840_v30 }
 0x25f   : > { %v458_v53 = vpop.f32.mrb[0].mxu1 }
 0x260   : > { %v462_v54 = vmax.f32 %v458_v53, 0.0  ;;  %v708_v55 = vpop.f32.mrb[1].mxu1 }
 0x262   : > { %712 = vmatmul.mubr.msk.f32.vlgmr.msra.gmra.mrb[2].mxu1 %vm464_vm9, %v462_v54 }
 0x335   : > { %v538_v56 = vpop.f32.mrb[2].mxu1 }
 0x336   : > { %v667_v57 = vmul.f32 -1.442695, %v538_v56  ;;  %v713_v58 = vpop.f32.mrb[3].mxu1 }
 0x338   : > { %770 = vpow2.f32 %v667_v57 }
 0x342   : > { %v771_v59 = vpop.eup %770 }
 0x343   : > { %v545_v60 = vadd.f32 1.0, %v771_v59 }
 0x345   : > { %772 = vrcp.f32 %v545_v60 }
 0x34f   : > { %v773_v62 = vpop.eup %772 }
 0x350   : > { %v551_v63 = vrot.slane %v773_v62, %v550_v61 }
 0x352   : > { %557 = vbcast.lane.b32.xlu1 %v551_v63, 264  ;;  %553 = vbcast.lane.b32.xlu0 %v551_v63, 256 }
 0x356   : > { %561 = vbcast.lane.b32.xlu1 %v551_v63, 272 }
 0x35a   : > { %565 = vbcast.lane.b32.xlu1 %v551_v63, 280 }
 0x3c4   : > { %v558_v0 = vpop.permute.xlu1 %557  ;;  %v554_v1 = vpop.permute.xlu0 %553 }
 0x3c5   : > { %v568_v2 = vmul.f32 %v558_v0, %v939_v4  ;;  %v567_v7 = vmul.f32 %v554_v1, %v935_v3 }
 0x3c7   : > { %572 = vst.msk [vmem:[%s217_s23 + $0x8] sm:$0xff] %vm229_vm0, %v568_v2  ;;  %571 = vst.msk [vmem:[%s217_s23] sm:$0xff] %vm229_vm0, %v567_v7 }
 0x3c8   : > { %v562_v8 = vpop.permute.xlu1 %561 }
 0x3c9   : > { %v569_v9 = vmul.f32 %v562_v8, %v941_v5 }
 0x3cb   : > { %573 = vst.msk [vmem:[%s217_s23 + $0x10] sm:$0xff] %vm229_vm0, %v569_v9 }
 0x3cc   : > { %v566_v4 = vpop.permute.xlu1 %565 }
 0x3cd   : > { %v570_v3 = vmul.f32 %v566_v4, %v947_v6 }
 0x3cf   : > { %574 = vst.msk [vmem:[%s217_s23 + $0x18] sm:$0xff] %vm229_vm0, %v570_v3 }
 0x3d0   : > { %787 = shalt.err (!%p784_p3)
}
 0x3d1   : > { %s788_s12 = scalar_lea.hbm %s993_s7, 512  ;;  %s792_s15 = scalar_lea.hbm %s1043_s5, 1024 }
 0x3d2   : > { %p789_p4 = scmp.ne.s32.totalorder %s993_s7, %s788_s12  ;;  %p793_p9 = scmp.lt.u32.totalorder %s993_s7, %s1043_s5 }
 0x3d3   : > { %p794_p10 = scmp.lt.u32.totalorder %s792_s15, %s788_s12  ;;  %p796_p12 = scmp.lt.u32.totalorder %s788_s12, %s993_s7 }
 0x3d4   : > { %p790_p7 = pnand %p789_p4, %p912_p5 }
 0x3d5   : > { %p795_p11 = por %p794_p10, %p793_p9 }
 0x3d6   : > { %p791_p8 = pneg %p790_p7 }
 0x3d7   : > { %p797_p13 = por %p796_p12, %p795_p11 }
 0x3d9   : > { %p798_p0 = pnand %p797_p13, %p791_p8 }
 0x3db   : > { %801 = shalt.err (!%p798_p0)
}
 0x3dc   : > { %s842_s23 = smov 128   ;;  %s843_s26 = smov 8  }
 0x3dd   : > { %726 = dma.vmem_to_hbm [thread:$0]  (%p912_p5), %s988_s25, 512, %s993_s7, %s997_s8, %s842_s23, %s842_s23, %s843_s26  }
 0x3de PF: > { %p732_p1 = scmp.ge.s32.totalorder %s836_s21, 2  ;;  %s604_s30 = sand.u32 1, %s824_s18  }
 0x3df   : > { %s605_s6 = scalar_lea.sflag [#allocation3], %s604_s30 }
 0x3e0   : > { %p729_p2 = pnand %p732_p1, %p916_p6 }
 0x3e2   : > { %819 = dma.done.wait (!%p729_p2), %s605_s6, 512  }
 0x3e3   : > { %821 = vsyncadd (!%p729_p2), %s605_s6, 4294966784  ;;  %p15_p3 = scmp.ge.s32.totalorder %s899_s24, 4   ;;  %s1046_s18 = smov %s828_s19 }
 0x3e4   : > { %s1047_s19 = smov %s832_s20  ;;  %s1048_s20 = smov %s910_s27 }
 0x3e5   : > { %s1049_s21 = smov %s899_s24  ;;  %17 = sbr.rel (!%p15_p3) target bundleno = 3 (0x3), region = 75 }
 0x3ec   :  { %610 = vsyncpa [#allocation3], 1 }
 0x3ed   :  { %612 = vsyncpa [#allocation3 + $0x1], 1 }

</bundles_post_ra>
